<compile_context>
chip_gen: v7x
topology: tpu7x:2x2x1
jax: 0.10.0
libtpu: 0.0.40
codegen_flags: <defaults>
</compile_context>

<pallas_src>
import jax
import jax.numpy as jnp
from jax.experimental import pallas as pl
from jax.experimental.pallas import tpu as pltpu


# --------------------------------------------------------------------------
# Kernels: write the learnable ctx rows [1, 1+n_ctx) of every class into the
# aliased (n_cls, L, D) prompt buffer.  prefix/suffix rows are already there.
# --------------------------------------------------------------------------


def _write_ctx_generic_kernel(ctx_ref, tmpl_ref, out_ref, vbuf_ref, sems_ref):
    """Generic (shared) context, broadcast across all classes.

    ctx_ref:  (1, n_ctx, D) in VMEM, learnable context (any float dtype)
    tmpl_ref: (n_cls, L, D) in HBM, aliased with out_ref (unused here)
    out_ref:  (n_cls, L, D) in HBM; prefix/suffix rows already in place
    vbuf_ref: (block_cls, n_ctx, D) VMEM staging tile, output dtype
    sems_ref: (n_blocks,) DMA semaphores
    """
    del tmpl_ref
    block_cls, n_ctx, _ = vbuf_ref.shape
    n_cls = out_ref.shape[0]
    n_blocks = (n_cls + block_cls - 1) // block_cls

    # Cast + broadcast in-register (VPU; this is the only vector work).
    vbuf_ref[...] = jnp.broadcast_to(
        ctx_ref[...].astype(vbuf_ref.dtype), vbuf_ref.shape)

    # One strided VMEM->HBM DMA per class block.  All DMAs read the same vbuf,
    # so they can all be in flight at once; the last block is clamped to
    # overlap the previous one (rewrites identical values - benign).
    copies = []
    for b in range(n_blocks):
        start = min(b * block_cls, n_cls - block_cls)
        cp = pltpu.make_async_copy(
            vbuf_ref,
            out_ref.at[pl.ds(start, block_cls), pl.ds(1, n_ctx), :],
            sems_ref.at[b])
        cp.start()
        copies.append(cp)
    for cp in copies:
        cp.wait()


def _write_ctx_csc_copy_kernel(ctx_ref, tmpl_ref, out_ref, sem_ref):
    """Class-specific ctx, same dtype as the template: one HBM->HBM DMA."""
    del tmpl_ref
    n_cls, n_ctx, _ = ctx_ref.shape
    cp = pltpu.make_async_copy(
        ctx_ref,
        out_ref.at[pl.ds(0, n_cls), pl.ds(1, n_ctx), :],
        sem_ref.at[0])
    cp.start()
    cp.wait()


def _write_ctx_csc_cast_kernel(ctx_ref, tmpl_ref, out_ref, in_buf, out_buf, sems):
    """Class-specific ctx with dtype != template dtype.

    Stage a block of classes through VMEM, cast in-register (no wrapper-side
    astype pass over HBM), DMA the cast block onto the ctx rows.
    """
    del tmpl_ref
    block_cls, n_ctx, _ = in_buf.shape
    n_cls = out_ref.shape[0]
    n_blocks = (n_cls + block_cls - 1) // block_cls
    # TODO(synk): double-buffer in_buf/out_buf to overlap the in/out DMAs of
    # consecutive blocks; left serial since mixed-dtype CSC is a rare config.
    for b in range(n_blocks):
        start = min(b * block_cls, n_cls - block_cls)
        cin = pltpu.make_async_copy(
            ctx_ref.at[pl.ds(start, block_cls)], in_buf, sems.at[0])
        cin.start()
        cin.wait()
        out_buf[...] = in_buf[...].astype(out_buf.dtype)
        cout = pltpu.make_async_copy(
            out_buf,
            out_ref.at[pl.ds(start, block_cls), pl.ds(1, n_ctx), :],
            sems.at[1])
        cout.start()
        cout.wait()


# --------------------------------------------------------------------------
# Wrappers
# --------------------------------------------------------------------------


def build_prompt_template(token_prefix, token_suffix, n_ctx, dtype=None):
    """Init-time ("register_buffer") step: frozen (n_cls, L, D) template
    [ prefix | <n_ctx empty ctx slots> | suffix ].  Run once, not per forward.
    """
    n_cls, n_prefix, ctx_dim = token_prefix.shape
    assert n_prefix == 1, "module always uses a single SOS prefix token"
    assert token_suffix.shape[0] == n_cls and token_suffix.shape[2] == ctx_dim
    if dtype is None:
        dtype = token_prefix.dtype
    ctx_slots = jnp.zeros((n_cls, n_ctx, ctx_dim), dtype)
    return jnp.concatenate(
        [token_prefix.astype(dtype), ctx_slots, token_suffix.astype(dtype)],
        axis=1)


def prompt_learner_forward(ctx, prompt_template, class_token_position="end",
                           max_stage_bytes=2 << 20):
    """Pallas equivalent of TextPromptLearnerWithoutSummary.forward().

    ctx:             (n_ctx, D) generic context OR (n_cls, n_ctx, D) class-specific
    prompt_template: (n_cls, L, D) from build_prompt_template().  Its buffer is
                     aliased as the output; pass it with donation
                     (jax.jit(..., donate_argnums=...)) and feed the returned
                     prompts back in as the next call's template (the kernels
                     never touch the prefix/suffix rows).
    returns:         prompts (n_cls, L, D) == concat([prefix, ctx, suffix], axis=1)
    """
    if class_token_position != "end":
        # TODO(synk): 'middle'/'front' need per-class name_lens dynamic slicing.
        raise NotImplementedError("only class_token_position='end' is implemented")

    n_cls, context_length, ctx_dim = prompt_template.shape
    out_dtype = prompt_template.dtype
    generic = (ctx.ndim == 2)
    if generic:
        n_ctx = ctx.shape[0]
        ctx3 = ctx[None]                      # (1, n_ctx, D)
    else:
        assert ctx.shape[0] == n_cls, "class-specific ctx must have n_cls rows"
        n_ctx = ctx.shape[1]
        ctx3 = ctx                            # (n_cls, n_ctx, D)
    assert ctx.shape[-1] == ctx_dim
    assert 1 + n_ctx <= context_length

    out_shape = jax.ShapeDtypeStruct((n_cls, context_length, ctx_dim), out_dtype)
    itemsize = jnp.dtype(out_dtype).itemsize
    per_cls_bytes = max(n_ctx * ctx_dim * itemsize, 1)
    block_cls = max(1, min(n_cls, int(max_stage_bytes // per_cls_bytes)))
    n_blocks = (n_cls + block_cls - 1) // block_cls

    any_spec = pl.BlockSpec(memory_space=pl.ANY)

    if generic:
        # ctx lives in VMEM (it is tiny); template/output stay in HBM.
        return pl.pallas_call(
            _write_ctx_generic_kernel,
            out_shape=out_shape,
            in_specs=[pl.BlockSpec(memory_space=pltpu.MemorySpace.VMEM),
                      any_spec],
            out_specs=any_spec,
            scratch_shapes=[
                pltpu.VMEM((block_cls, n_ctx, ctx_dim), out_dtype),
                pltpu.SemaphoreType.DMA((n_blocks,)),
            ],
            input_output_aliases={1: 0},
        )(ctx3, prompt_template)

    if ctx3.dtype == out_dtype:
        # Best case: one strided HBM->HBM DMA, zero VMEM, zero vector work.
        return pl.pallas_call(
            _write_ctx_csc_copy_kernel,
            out_shape=out_shape,
            in_specs=[any_spec, any_spec],
            out_specs=any_spec,
            scratch_shapes=[pltpu.SemaphoreType.DMA((1,))],
            input_output_aliases={1: 0},
        )(ctx3, prompt_template)

    # Class-specific ctx whose dtype differs from the frozen-embedding dtype:
    # stage blocks through VMEM and cast in-register.
    return pl.pallas_call(
        _write_ctx_csc_cast_kernel,
        out_shape=out_shape,
        in_specs=[any_spec, any_spec],
        out_specs=any_spec,
        scratch_shapes=[
            pltpu.VMEM((block_cls, n_ctx, ctx_dim), ctx3.dtype),
            pltpu.VMEM((block_cls, n_ctx, ctx_dim), out_dtype),
            pltpu.SemaphoreType.DMA((2,)),
        ],
        input_output_aliases={1: 0},
    )(ctx3, prompt_template)


# --------------------------------------------------------------------------
# Demo / self-test
# --------------------------------------------------------------------------

if __name__ == "__main__":
    # Small deterministic synthetic configuration (no tokenizer / checkpoint):
    # n_cls = 8, n_ctx = 4 learnable tokens, context_length = 16, ctx_dim = 128
    # (lane-dense; real CLIP uses L=77, D=512).
    n_cls = 8
    n_ctx = 4
    context_length = 16
    ctx_dim = 128
    n_suffix = context_length - 1 - n_ctx

    key = jax.random.PRNGKey(0)
    k_ctx, k_pre, k_suf, k_csc = jax.random.split(key, 4)

    # nn.init.normal_(ctx_vectors, std=0.02)  -- generic context (CSC=False)
    ctx = 0.02 * jax.random.normal(k_ctx, (n_ctx, ctx_dim), dtype=jnp.float32)
    # Stand-ins for the frozen CLIP token embeddings.
    token_prefix = jax.random.normal(k_pre, (n_cls, 1, ctx_dim), dtype=jnp.float32)
    token_suffix = jax.random.normal(k_suf, (n_cls, n_suffix, ctx_dim), dtype=jnp.float32)

    # "init": build the frozen prompt template once (register_buffer analogue).
    template = jax.block_until_ready(
        build_prompt_template(token_prefix, token_suffix, n_ctx))

    # Per-forward hot path: donate the template so the kernel writes in place.
    fwd = jax.jit(lambda c, t: prompt_learner_forward(c, t), donate_argnums=(1,))

    # --- generic context (CSC=False): broadcast ctx, strided VMEM->HBM DMAs ---
    prompts = jax.block_until_ready(fwd(ctx, template))
    ctx_b = jnp.broadcast_to(ctx[None], (n_cls, n_ctx, ctx_dim))
    ref = jnp.concatenate([token_prefix, ctx_b, token_suffix], axis=1)
    assert prompts.shape == (n_cls, context_length, ctx_dim), prompts.shape
    assert prompts.dtype == token_prefix.dtype
    assert jnp.array_equal(prompts, ref), "generic-ctx mismatch"

    # --- class-specific context (CSC=True), same dtype: one HBM->HBM DMA ---
    # Recycle the prompts buffer as the next template (prefix/suffix untouched).
    ctx_csc = 0.02 * jax.random.normal(
        k_csc, (n_cls, n_ctx, ctx_dim), dtype=jnp.float32)
    prompts_csc = jax.block_until_ready(fwd(ctx_csc, prompts))
    ref_csc = jnp.concatenate([token_prefix, ctx_csc, token_suffix], axis=1)
    assert jnp.array_equal(prompts_csc, ref_csc), "CSC-ctx mismatch"

    # --- class-specific ctx whose dtype differs from the template: in-kernel cast ---
    template2 = jax.block_until_ready(
        build_prompt_template(token_prefix, token_suffix, n_ctx))
    ctx_csc_lowp = ctx_csc.astype(jnp.bfloat16)
    prompts_cast = jax.block_until_ready(fwd(ctx_csc_lowp, template2))
    ref_cast = jnp.concatenate(
        [token_prefix, ctx_csc_lowp.astype(jnp.float32), token_suffix], axis=1)
    assert prompts_cast.dtype == jnp.float32
    assert jnp.array_equal(prompts_cast, ref_cast), "mixed-dtype CSC mismatch"

    print("KERNEL_OK")
</pallas_src>

<mosaic_0001>
module attributes {stable_mosaic.version = 11 : i64} {
  func.func @_write_ctx_generic_kernel(%arg0: memref<1x4x128xf32, #tpu.memory_space<vmem>>, %arg1: memref<8x16x128xf32, #tpu.memory_space<any>>, %arg2: memref<8x16x128xf32, #tpu.memory_space<any>>, %arg3: memref<8x4x128xf32, #tpu.memory_space<vmem>>, %arg4: memref<1x!tpu.dma_semaphore, #tpu.memory_space<semaphore_mem>>) attributes {dimension_semantics = [], scalar_prefetch = 0 : i64, scratch_operands = 2 : i64, tpu.core_type = #tpu.core_type<tc>} {
    %c0 = arith.constant 0 : index
    %c0_0 = arith.constant 0 : index
    %c0_1 = arith.constant 0 : index
    %0 = vector.load %arg0[%c0, %c0_0, %c0_1] : memref<1x4x128xf32, #tpu.memory_space<vmem>>, vector<1x4x128xf32>
    %1 = vector.shape_cast %0 : vector<1x4x128xf32> to vector<1x4x128xf32>
    %2 = vector.broadcast %1 : vector<1x4x128xf32> to vector<8x4x128xf32>
    %c0_2 = arith.constant 0 : index
    %c0_3 = arith.constant 0 : index
    %c0_4 = arith.constant 0 : index
    %3 = vector.load %arg3[%c0_2, %c0_3, %c0_4] : memref<8x4x128xf32, #tpu.memory_space<vmem>>, vector<8x4x128xf32>
    tpu.vector_store %arg3[%c0_2, %c0_3, %c0_4], %2 {strides = array<i32>} : memref<8x4x128xf32, #tpu.memory_space<vmem>>, vector<8x4x128xf32>,
    %c0_i32 = arith.constant 0 : i32
    %c0_i32_5 = arith.constant 0 : i32
    %c1_i32 = arith.constant 1 : i32
    %c0_i32_6 = arith.constant 0 : i32
    %4 = tpu.memref_slice %arg2[%c0_i32_5, %c1_i32, %c0_i32_6] : memref<8x16x128xf32, #tpu.memory_space<any>> -> memref<8x4x128xf32, #tpu.memory_space<any>>
    %5 = tpu.memref_slice %arg4[%c0_i32] : memref<1x!tpu.dma_semaphore, #tpu.memory_space<semaphore_mem>> -> memref<1x!tpu.dma_semaphore, #tpu.memory_space<semaphore_mem>>
    %6 = tpu.memref_squeeze %5 : memref<1x!tpu.dma_semaphore, #tpu.memory_space<semaphore_mem>> -> memref<!tpu.dma_semaphore, #tpu.memory_space<semaphore_mem>>
    tpu.enqueue_dma source(%arg3 : memref<8x4x128xf32, #tpu.memory_space<vmem>>) target(%4 : memref<8x4x128xf32, #tpu.memory_space<any>>) target_semaphore(%6 : memref<!tpu.dma_semaphore, #tpu.memory_space<semaphore_mem>>)
    %c0_i32_7 = arith.constant 0 : i32
    %c0_i32_8 = arith.constant 0 : i32
    %c1_i32_9 = arith.constant 1 : i32
    %c0_i32_10 = arith.constant 0 : i32
    %7 = tpu.memref_slice %arg2[%c0_i32_8, %c1_i32_9, %c0_i32_10] : memref<8x16x128xf32, #tpu.memory_space<any>> -> memref<8x4x128xf32, #tpu.memory_space<any>>
    %8 = tpu.memref_slice %arg4[%c0_i32_7] : memref<1x!tpu.dma_semaphore, #tpu.memory_space<semaphore_mem>> -> memref<1x!tpu.dma_semaphore, #tpu.memory_space<semaphore_mem>>
    %9 = tpu.memref_squeeze %8 : memref<1x!tpu.dma_semaphore, #tpu.memory_space<semaphore_mem>> -> memref<!tpu.dma_semaphore, #tpu.memory_space<semaphore_mem>>
    tpu.wait_dma2 semaphore(%9 : memref<!tpu.dma_semaphore, #tpu.memory_space<semaphore_mem>>) src(%arg3 : memref<8x4x128xf32, #tpu.memory_space<vmem>>) dst(%7 : memref<8x4x128xf32, #tpu.memory_space<any>>)
    return
  }
}

</mosaic_0001>

<bundles_post_ra>
// kernel: _lambda_.1
= control target key start
LH: loop header
LB: loop body
LE: loop exit
PB: predicated region body
PF: predicated region fallthrough
CT: control target
= control target key end

     0   :  { %7 = vsyncpa [#allocation5], 0  ;;  %s104_s9 = smov [#allocation4]   ;;  %s161_s0 = inlined_call_operand.hbm [shape: f32[1,4,128], index: 0, kind: input, shape index: {}]   ;;  %s162_s1 = inlined_call_operand.hbm [shape: f32[8,16,128], index: 1, kind: input, shape index: {}, may-alias: {1,2}]   ;;  %s163_s2 = inlined_call_operand.hbm [shape: f32[8,16,128], index: 2, kind: output, shape index: {}, may-alias: {1,2}]  }
   0x1   :  { %s14_s10 = sshll.u32 %s104_s9, 4  ;;  %s53_s13 = scalar_lea.hbm %s161_s0, 64  ;;  %s15_s10 = int_to_ptr.vmem [resolvable:$true] %s14_s10 }
   0x2   :  { %p54_p0 = scmp.ne.s32.totalorder %s161_s0, %s53_s13  ;;  %p57_p1 = scmp.lt.u32.totalorder %s53_s13, %s161_s0 }
   0x4   :  { %p59_p2 = pnand %p57_p1, %p54_p0 }
   0x6   :  { %62 = shalt.err (!%p59_p2)
}
   0x7   :  { %s63_s1 = scalar_lea.vmem %s15_s10, 64  ;;  %p68_p4 = scmp.lt.s32.totalorder %s15_s10, %s15_s10 }
   0x8   :  { %p64_p3 = scmp.ne.s32.totalorder %s15_s10, %s63_s1  ;;  %p69_p5 = scmp.lt.s32.totalorder %s63_s1, %s63_s1 }
   0xa   :  { %p70_p6 = por %p69_p5, %p68_p4 }
   0xc   :  { %p71_p7 = pnand %p70_p6, %p64_p3 }
   0xe   :  { %74 = shalt.err (!%p71_p7)
}
   0xf   :  { %17 = dma.hbm_to_vmem [thread:$0]  %s161_s0, 64, %s15_s10, [#allocation5]  }
  0x10   :  { %100 = dma.done.wait [#allocation5], 64  }
  0x11   :  { %101 = vsyncadd [#allocation5], 4294967232  ;;  %s105_s20 = smov [#allocation2]   ;;  %s139_s24 = scalar_lea.hbm %s163_s2, 16  ;;  %v21_v0 = vld [vmem:[#allocation4] sm:$0xf] }
  0x12   :  { %s32_s21 = sshll.u32 %s105_s20, 4  ;;  %22 = vst [vmem:[#allocation2] sm:$0xf] %v21_v0  ;;  %23 = vst [vmem:[#allocation2 + $0x4] sm:$0xf] %v21_v0  ;;  %s141_s21 = int_to_ptr.vmem [resolvable:$true] %s32_s21 }
  0x13   :  { %24 = vst [vmem:[#allocation2 + $0x8] sm:$0xf] %v21_v0  ;;  %25 = vst [vmem:[#allocation2 + $0xc] sm:$0xf] %v21_v0  ;;  %s75_s0 = scalar_lea.vmem %s141_s21, 512  ;;  %p80_p9 = scmp.lt.s32.totalorder %s141_s21, %s141_s21 }
  0x14   :  { %26 = vst [vmem:[#allocation2 + $0x10] sm:$0xf] %v21_v0  ;;  %27 = vst [vmem:[#allocation2 + $0x14] sm:$0xf] %v21_v0  ;;  %p76_p8 = scmp.ne.s32.totalorder %s141_s21, %s75_s0  ;;  %p81_p10 = scmp.lt.s32.totalorder %s75_s0, %s75_s0 }
  0x15   :  { %28 = vst [vmem:[#allocation2 + $0x18] sm:$0xf] %v21_v0  ;;  %29 = vst [vmem:[#allocation2 + $0x1c] sm:$0xf] %v21_v0 }
  0x16   :  { %p82_p11 = por %p81_p10, %p80_p9 }
  0x18   :  { %p83_p12 = pnand %p82_p11, %p76_p8 }
  0x1a   :  { %86 = shalt.err (!%p83_p12)  }
  0x1b   :  { %s99_s27 = scalar_lea.hbm %s163_s2, 528  ;;  %s89_s30 = scalar_lea.hbm %s163_s2, 2048 }
  0x1c   :  { %p88_p13 = scmp.ne.s32.totalorder %s139_s24, %s99_s27  ;;  %p90_p0 = scmp.lt.u32.totalorder %s139_s24, %s163_s2 }
  0x1d   :  { %p91_p1 = scmp.lt.u32.totalorder %s89_s30, %s99_s27  ;;  %p93_p3 = scmp.lt.u32.totalorder %s99_s27, %s139_s24 }
  0x1f   :  { %p92_p2 = por %p91_p1, %p90_p0 }
  0x21   :  { %p94_p4 = por %p93_p3, %p92_p2 }
  0x23   :  { %p95_p5 = pnand %p94_p4, %p88_p13 }
  0x25   :  { %98 = shalt.err (!%p95_p5)  }
  0x26   :  { %s106_s5 = smov 64   ;;  %s107_s6 = smov 256  }
  0x27   :  { %s108_s7 = smov 4  }
  0x28   :  { %35 = dma.vmem_to_hbm [thread:$0]  %s141_s21, 512, %s139_s24, [#allocation3], %s106_s5, %s107_s6, %s108_s7 }
  0x29   :  { %102 = dma.done.wait [#allocation3], 512 }
  0x2a   :  { %103 = vsyncadd [#allocation3], 4294966784 }
  0x2b   :  { %40 = vsyncpa [#allocation5], 1 }
  0x2c   :  { %41 = vsyncmov [#allocation3] }
  0x2f   :  { %s42_s8 = vpop.sfrf %41 }
  0x30   :  { %p47_p6 = scmp.ne.s32.totalorder %s42_s8, 0 }
  0x32   :  { %46 = shalt.err (%p47_p6)  }

</bundles_post_ra>
